<compile_context>
chip_gen: v5e
topology: v5e:2x2
jax: 0.10.0
libtpu: 0.0.40
codegen_flags: <defaults>
</compile_context>

<pallas_src>
import jax
import jax.numpy as jnp
import numpy as np
from jax.experimental import pallas as pl
from jax.experimental.pallas import tpu as pltpu


def _round_up(x, m):
    return ((x + m - 1) // m) * m


def _cdiv(a, b):
    return (a + b - 1) // b


def alpha_controller_kernel(x_ref, w1_ref, b1_ref, w2_ref, b2_ref, o_ref):
    # Layer 1 on the MXU: h = relu(x @ W1 + b1), f32 accumulation.  (tb, D)
    h = jnp.dot(x_ref[...], w1_ref[...], preferred_element_type=jnp.float32)
    h = jnp.maximum(h + b1_ref[...], 0.0)

    # Layer 2 as w2 (1, D) contracted with h (tb, D) on the last dims
    # (i.e. w2 @ h^T) -> a lane-dense (1, tb) row.  Same contraction pattern as
    # q @ k.T; keeps the final store unmasked along lanes.
    z = jax.lax.dot_general(
        w2_ref[...], h,
        dimension_numbers=(((1,), (1,)), ((), ())),
        preferred_element_type=jnp.float32)
    z = z + b2_ref[0]                                   # scalar bias from SMEM

    # Sigmoid on the EUP: exp + approximate reciprocal (keeps the VPU free).
    s = pl.reciprocal(1.0 + jnp.exp(-z), approx=True)   # (1, tb)
    o_ref[...] = s.reshape(o_ref.shape).astype(o_ref.dtype)


def alpha_controller(x, w1, b1, w2, b2, *, block_b=2048, use_pallas=None):
    """x: (B, D) f32. w1: (D, D) pre-transposed, b1: (D,), w2: (D, 1), b2: (1,)."""
    B, D = x.shape

    # Tiny problems: custom-call + per-step overhead dwarfs compute -> plain XLA.
    if use_pallas is None:
        use_pallas = B * D >= 32768
    if not use_pallas:
        h = jnp.maximum(x @ w1 + b1, 0.0)
        return jax.nn.sigmoid(h @ w2 + b2)

    w1f = w1.astype(jnp.float32)
    b1_row = b1.reshape(1, D).astype(jnp.float32)
    w2_row = w2.reshape(1, D).astype(jnp.float32)   # (D, 1) -> (1, D) row vector
    b2_s = b2.reshape(1).astype(jnp.float32)        # scalar -> SMEM

    # Batch tiling: tb is a multiple of 128 (lane-dense output rows); keep at
    # least 2 grid steps when possible so both v7x TensorCores get work.
    Bp = _round_up(B, 128)
    num_tiles = max(_cdiv(Bp, block_b), 1)
    if num_tiles == 1 and Bp >= 256:
        num_tiles = 2
    tb = _round_up(_cdiv(Bp, num_tiles), 128)
    Bp = tb * num_tiles

    xf = x.astype(jnp.float32)
    if Bp != B:
        xf = jnp.pad(xf, ((0, Bp - B), (0, 0)))

    cost = pl.CostEstimate(
        flops=2 * Bp * D * D + 2 * Bp * D + 4 * Bp,
        transcendentals=Bp,                               # sigmoid exp per row
        bytes_accessed=4 * (Bp * D + D * D + 2 * D + 1 + Bp),
    )

    # Explicit scoped-VMEM budget (v7x: 64 MiB physical).  Double-buffer x and
    # the output row; weights are grid-invariant but budgeted double-buffered
    # to stay conservative.  (On v7x with large D, add pipeline_mode=
    # pl.Buffered(1) to the weight specs to single-buffer them.)
    vmem_need = 4 * (2 * tb * D + 2 * (D * D + 2 * D) + 2 * tb)
    vmem_limit = max(16 << 20, 2 * vmem_need + (4 << 20))

    out = pl.pallas_call(
        alpha_controller_kernel,
        out_shape=jax.ShapeDtypeStruct((num_tiles, 1, tb), xf.dtype),
        grid=(num_tiles,),
        in_specs=[
            # Activations: streamed per batch tile.
            pl.BlockSpec((tb, D), lambda i: (i, 0),
                         memory_space=pltpu.MemorySpace.VMEM),
            # Weights / biases: resident across all batch tiles.
            pl.BlockSpec((D, D), lambda i: (0, 0),
                         memory_space=pltpu.MemorySpace.VMEM),
            pl.BlockSpec((1, D), lambda i: (0, 0),
                         memory_space=pltpu.MemorySpace.VMEM),
            pl.BlockSpec((1, D), lambda i: (0, 0),
                         memory_space=pltpu.MemorySpace.VMEM),
            # b2: tiny scalar -> SMEM (no padded VMEM tile / extra DMA).
            pl.BlockSpec(memory_space=pltpu.MemorySpace.SMEM),
        ],
        # Lane-dense (1, tb) row per grid step.
        out_specs=pl.BlockSpec((1, 1, tb), lambda i: (i, 0, 0),
                               memory_space=pltpu.MemorySpace.VMEM),
        compiler_params=pltpu.CompilerParams(
            dimension_semantics=("parallel",),
            vmem_limit_bytes=vmem_limit),
        cost_estimate=cost,
    )(xf, w1f, b1_row, w2_row, b2_s)

    # (num_tiles, 1, tb) row-slab -> (Bp, 1) column, drop padding rows.
    return out.reshape(Bp, 1)[:B]


def init_params(key, input_dim):
    """Deterministic init mimicking PyTorch nn.Linear defaults (uniform +-1/sqrt(fan_in))."""
    k1, k2, k3, k4 = jax.random.split(key, 4)
    bound = 1.0 / np.sqrt(input_dim)
    # fc[0]: Linear(input_dim, input_dim), stored transposed (in, out).
    w1 = jax.random.uniform(k1, (input_dim, input_dim), jnp.float32, -bound, bound)
    b1 = jax.random.uniform(k2, (input_dim,), jnp.float32, -bound, bound)
    # fc[2]: Linear(input_dim, 1), stored transposed (in, 1).
    w2 = jax.random.uniform(k3, (input_dim, 1), jnp.float32, -bound, bound)
    b2 = jax.random.uniform(k4, (1,), jnp.float32, -bound, bound)
    return w1, b1, w2, b2


if __name__ == "__main__":
    key = jax.random.PRNGKey(0)
    kx, kp, kx2 = jax.random.split(key, 3)

    input_dim = 32
    w1, b1, w2, b2 = init_params(kp, input_dim)

    def reference(x):
        h = jnp.maximum(x @ w1 + b1, 0.0)
        return jax.nn.sigmoid(h @ w2 + b2)

    # 1) Small demo shape (B=8, D=32).
    x_small = jax.random.normal(kx, (8, input_dim), jnp.float32)
    # Default dispatch sends this tiny case down the fused plain-XLA fast path.
    out_fast = jax.block_until_ready(alpha_controller(x_small, w1, b1, w2, b2))
    np.testing.assert_allclose(np.asarray(out_fast), np.asarray(reference(x_small)),
                               rtol=1e-5, atol=1e-6)
    # Force the Pallas kernel on the small case as well (tolerance loosened only
    # for the approximate-reciprocal sigmoid on the EUP).
    out_small = jax.block_until_ready(
        alpha_controller(x_small, w1, b1, w2, b2, use_pallas=True))
    np.testing.assert_allclose(np.asarray(out_small), np.asarray(reference(x_small)),
                               rtol=5e-3, atol=5e-3)
    assert out_small.shape == (8, 1)

    # 2) A batch large enough that the size dispatch picks the Pallas path and
    #    the grid has 2 tiles (exercises the multi-step / parallel-axis path).
    x_big = jax.random.normal(kx2, (1536, input_dim), jnp.float32)
    out_big = jax.block_until_ready(alpha_controller(x_big, w1, b1, w2, b2))
    np.testing.assert_allclose(np.asarray(out_big), np.asarray(reference(x_big)),
                               rtol=5e-3, atol=5e-3)
    assert out_big.shape == (1536, 1)

    print("KERNEL_OK")
</pallas_src>

<mosaic_0001>
module attributes {stable_mosaic.version = 11 : i64} {
  func.func @alpha_controller_kernel(%arg0: i32, %arg1: memref<128x32xf32, #tpu.memory_space<vmem>>, %arg2: memref<32x32xf32, #tpu.memory_space<vmem>>, %arg3: memref<1x32xf32, #tpu.memory_space<vmem>>, %arg4: memref<1x32xf32, #tpu.memory_space<vmem>>, %arg5: memref<1xf32, #tpu.memory_space<smem>>, %arg6: memref<1x1x128xf32, #tpu.memory_space<vmem>>) attributes {dimension_semantics = [#tpu.dimension_semantics<parallel>], iteration_bounds = array<i64: 1>, scalar_prefetch = 0 : i64, scratch_operands = 0 : i64, tpu.core_type = #tpu.core_type<tc>, window_params = [{transform_indices = @transform_0, window_bounds = array<i64: 128, 32>}, {pipeline_mode = #tpu.pipeline_mode<synchronous>, transform_indices = @transform_1, window_bounds = array<i64: 32, 32>}, {pipeline_mode = #tpu.pipeline_mode<synchronous>, transform_indices = @transform_2, window_bounds = array<i64: 1, 32>}, {pipeline_mode = #tpu.pipeline_mode<synchronous>, transform_indices = @transform_3, window_bounds = array<i64: 1, 32>}, {transform_indices = @transform_4, window_bounds = array<i64: 1>}, {transform_indices = @transform_5, window_bounds = array<i64: 1, 1, 128>}]} {
    %c0 = arith.constant 0 : index
    %c0_0 = arith.constant 0 : index
    %0 = vector.load %arg1[%c0, %c0_0] : memref<128x32xf32, #tpu.memory_space<vmem>>, vector<128x32xf32>
    %c0_1 = arith.constant 0 : index
    %c0_2 = arith.constant 0 : index
    %1 = vector.load %arg2[%c0_1, %c0_2] : memref<32x32xf32, #tpu.memory_space<vmem>>, vector<32x32xf32>
    %cst = arith.constant dense<0.000000e+00> : vector<128x32xf32>
    %2 = tpu.matmul %0, %1, %cst {dimension_numbers = #tpu.dot_dimension_numbers<[1], [0], [0], [1], [0, 0, 1, 1], [], []>} : vector<128x32xf32>, vector<32x32xf32>, vector<128x32xf32> -> vector<128x32xf32>
    %c0_3 = arith.constant 0 : index
    %c0_4 = arith.constant 0 : index
    %3 = vector.load %arg3[%c0_3, %c0_4] : memref<1x32xf32, #tpu.memory_space<vmem>>, vector<1x32xf32>
    %4 = vector.broadcast %3 : vector<1x32xf32> to vector<128x32xf32>
    %5 = arith.addf %2, %4 : vector<128x32xf32>
    %cst_5 = arith.constant 0.000000e+00 : f32
    %6 = vector.broadcast %cst_5 : f32 to vector<128x32xf32>
    %7 = arith.maximumf %5, %6 : vector<128x32xf32>
    %c0_6 = arith.constant 0 : index
    %c0_7 = arith.constant 0 : index
    %8 = vector.load %arg4[%c0_6, %c0_7] : memref<1x32xf32, #tpu.memory_space<vmem>>, vector<1x32xf32>
    %cst_8 = arith.constant dense<0.000000e+00> : vector<1x128xf32>
    %9 = tpu.matmul %8, %7, %cst_8 {dimension_numbers = #tpu.dot_dimension_numbers<[1], [1], [0], [0], [0, 0, 1, 0], [], []>} : vector<1x32xf32>, vector<128x32xf32>, vector<1x128xf32> -> vector<1x128xf32>
    %c0_9 = arith.constant 0 : index
    %10 = memref.load %arg5[%c0_9] : memref<1xf32, #tpu.memory_space<smem>>
    %11 = vector.broadcast %10 : f32 to vector<1x128xf32>
    %12 = arith.addf %9, %11 : vector<1x128xf32>
    %cst_10 = arith.constant 0.000000e+00 : f32
    %13 = vector.broadcast %cst_10 : f32 to vector<1x128xf32>
    %14 = arith.subf %13, %12 : vector<1x128xf32>
    %15 = math.exp %14 : vector<1x128xf32>
    %cst_11 = arith.constant 1.000000e+00 : f32
    %16 = vector.broadcast %cst_11 : f32 to vector<1x128xf32>
    %17 = arith.addf %16, %15 : vector<1x128xf32>
    %18 = tpu.reciprocal %17 {approx = true} : vector<1x128xf32> -> vector<1x128xf32>
    %19 = vector.shape_cast %18 : vector<1x128xf32> to vector<1x1x128xf32>
    %c0_12 = arith.constant 0 : index
    %c0_13 = arith.constant 0 : index
    %c0_14 = arith.constant 0 : index
    %20 = vector.load %arg6[%c0_12, %c0_13, %c0_14] : memref<1x1x128xf32, #tpu.memory_space<vmem>>, vector<1x1x128xf32>
    tpu.vector_store %arg6[%c0_12, %c0_13, %c0_14], %19 {strides = array<i32>} : memref<1x1x128xf32, #tpu.memory_space<vmem>>, vector<1x1x128xf32>,
    return
  }
  func.func @transform_0(%arg0: i32) -> (i32, i32) {
    %c0_i32 = arith.constant 0 : i32
    %c0_i32_0 = arith.constant 0 : i32
    return %arg0, %c0_i32 : i32, i32
  }
  func.func @transform_1(%arg0: i32) -> (i32, i32) {
    %c0_i32 = arith.constant 0 : i32
    %c0_i32_0 = arith.constant 0 : i32
    %c0_i32_1 = arith.constant 0 : i32
    return %c0_i32, %c0_i32_0 : i32, i32
  }
  func.func @transform_2(%arg0: i32) -> (i32, i32) {
    %c0_i32 = arith.constant 0 : i32
    %c0_i32_0 = arith.constant 0 : i32
    %c0_i32_1 = arith.constant 0 : i32
    return %c0_i32, %c0_i32_0 : i32, i32
  }
  func.func @transform_3(%arg0: i32) -> (i32, i32) {
    %c0_i32 = arith.constant 0 : i32
    %c0_i32_0 = arith.constant 0 : i32
    %c0_i32_1 = arith.constant 0 : i32
    return %c0_i32, %c0_i32_0 : i32, i32
  }
  func.func @transform_4(%arg0: i32) -> i32 {
    %c0_i32 = arith.constant 0 : i32
    %c0_i32_0 = arith.constant 0 : i32
    return %c0_i32 : i32
  }
  func.func @transform_5(%arg0: i32) -> (i32, i32, i32) {
    %c0_i32 = arith.constant 0 : i32
    %c0_i32_0 = arith.constant 0 : i32
    %c0_i32_1 = arith.constant 0 : i32
    return %arg0, %c0_i32, %c0_i32_0 : i32, i32, i32
  }
}

</mosaic_0001>

<bundles_post_ra>
// kernel: tpu_custom_call.1
= control target key start
LH: loop header
LB: loop body
LE: loop exit
PB: predicated region body
PF: predicated region fallthrough
CT: control target
= control target key end

     0   :  { %vm46_vm0 = vcmask 261120   ;;  %s481_s0 = inlined_call_operand.vmem [shape: f32[128,32], index: 0, kind: input, shape index: {}]   ;;  %s482_s1 = inlined_call_operand.vmem [shape: f32[32,32], index: 1, kind: input, shape index: {}]   ;;  %s483_s2 = inlined_call_operand.vmem [shape: f32[1,32], index: 2, kind: input, shape index: {}]   ;;  %s484_s3 = inlined_call_operand.vmem [shape: f32[1,32], index: 3, kind: input, shape index: {}]   ;;  %s485_s4 = inlined_call_operand.<no memory space> [shape: f32[1], index: 4, kind: input, shape index: {}]   ;;  %s486_s5 = inlined_call_operand.hbm [shape: f32[1,1,128], index: 5, kind: output, shape index: {}]  }
   0x1   :  { %v41_v0 = vld [vmem:[%s482_s1 + $0x18] sm:$0xff]  ;;  %v40_v1 = vld [vmem:[%s482_s1 + $0x10] sm:$0xff]  ;;  %v39_v2 = vld [vmem:[%s482_s1 + $0x8] sm:$0xff] }
   0x2   :  { %305 = vmatpush.msra.mxu2 %v41_v0  ;;  %306 = vmatpush.msra.mxu3 %v41_v0  ;;  %v38_v3 = vld [vmem:[%s482_s1] sm:$0xff]  ;;  %v28_v4 = vld [vmem:[%s481_s0 + $0x30] sm:$0xff] }
   0x3   :  { %107 = vmatpush.msra.mxu0 %v41_v0  ;;  %v34_v5 = vld [vmem:[%s481_s0 + $0x60] sm:$0xff] }
   0x4   :  { %307 = vmatpush.msra.mxu2 %v40_v1  ;;  %308 = vmatpush.msra.mxu3 %v40_v1 }
   0x5   :  { %108 = vmatpush.msra.mxu0 %v40_v1 }
   0x6   :  { %309 = vmatpush.msra.mxu2 %v39_v2  ;;  %310 = vmatpush.msra.mxu3 %v39_v2 }
   0x7   :  { %11 = vsyncpa [#allocation4], 0  ;;  %109 = vmatpush.msra.mxu0 %v39_v2  ;;  %v22_v6 = vld [vmem:[%s481_s0] sm:$0xff]  ;;  %v29_v7 = vld [vmem:[%s481_s0 + $0x38] sm:$0xff]  ;;  %s345_s10 = smov [#allocation3]  }
   0x8   :  { %311 = vmatpush.msra.mxu2 %v38_v3  ;;  %312 = vmatpush.msra.mxu3 %v38_v3  ;;  %v35_v8 = vld [vmem:[%s481_s0 + $0x68] sm:$0xff]  ;;  %v30_v10 = vld [vmem:[%s481_s0 + $0x40] sm:$0xff]  ;;  %v36_v11 = vld [vmem:[%s481_s0 + $0x70] sm:$0xff]  ;;  %s261_s11 = sshll.u32 %s345_s10, 4  ;;  %s262_s11 = int_to_ptr.vmem [resolvable:$true] %s261_s11 }
   0x9   :  { %278 = vmatmul.msk.f32.vlgmr.msra.gmra.mxu2 %vm46_vm0, %v28_v4  ;;  %284 = vmatmul.msk.f32.vlgmr.msra.gmra.mxu3 %vm46_vm0, %v34_v5  ;;  %v23_v9 = vld [vmem:[%s481_s0 + $0x8] sm:$0xff]  ;;  %v24_v12 = vld [vmem:[%s481_s0 + $0x10] sm:$0xff]  ;;  %v37_v14 = vld [vmem:[%s481_s0 + $0x78] sm:$0xff] }
   0xa   :  { %110 = vmatpush.msra.mxu0 %v38_v3  ;;  %v31_v13 = vld [vmem:[%s481_s0 + $0x48] sm:$0xff]  ;;  %v25_v15 = vld [vmem:[%s481_s0 + $0x18] sm:$0xff]  ;;  %v32_v16 = vld [vmem:[%s481_s0 + $0x50] sm:$0xff] }
   0xb   :  { %272 = vmatmul.msk.f32.vlgmr.msra.gmra.mxu0 %vm46_vm0, %v22_v6  ;;  %v26_v17 = vld [vmem:[%s481_s0 + $0x20] sm:$0xff]  ;;  %v33_v18 = vld [vmem:[%s481_s0 + $0x58] sm:$0xff]  ;;  %v27_v19 = vld [vmem:[%s481_s0 + $0x28] sm:$0xff]  ;;  %v178_v6 = vstv %s485_s4 }
   0xc   :  { %v314_v28 = vld [vmem:[%s483_s2] ss:$0 sm:$0xff] }
   0xd   :  { %v176_v5 = vld [vmem:[%s484_s3] sm:$0x1]  ;;  %s263_s3 = sshll.u32 %s486_s5, 4  ;;  %s264_s3 = int_to_ptr.hbm [resolvable:$true] %s263_s3 }
  0x11   :  { %279 = vmatmul.msk.f32.gmra.mxu2 %vm46_vm0, %v29_v7  ;;  %285 = vmatmul.msk.f32.gmra.mxu3 %vm46_vm0, %v35_v8 }
  0x13   :  { %273 = vmatmul.msk.f32.gmra.mxu0 %vm46_vm0, %v23_v9 }
  0x19   :  { %280 = vmatmul.msk.f32.gmra.mxu2 %vm46_vm0, %v30_v10  ;;  %286 = vmatmul.msk.f32.gmra.mxu3 %vm46_vm0, %v36_v11 }
  0x1b   :  { %274 = vmatmul.msk.f32.gmra.mxu0 %vm46_vm0, %v24_v12 }
  0x21   :  { %281 = vmatmul.msk.f32.gmra.mxu2 %vm46_vm0, %v31_v13  ;;  %287 = vmatmul.msk.f32.gmra.mxu3 %vm46_vm0, %v37_v14 }
  0x23   :  { %275 = vmatmul.msk.f32.gmra.mxu0 %vm46_vm0, %v25_v15 }
  0x29   :  { %282 = vmatmul.msk.f32.gmra.mxu2 %vm46_vm0, %v32_v16 }
  0x2b   :  { %276 = vmatmul.msk.f32.gmra.mxu0 %vm46_vm0, %v26_v17 }
  0x31   :  { %283 = vmatmul.msk.f32.gmra.mxu2 %vm46_vm0, %v33_v18 }
  0x33   :  { %277 = vmatmul.msk.f32.gmra.mxu0 %vm46_vm0, %v27_v19 }
  0x88   :  { %v112_v22 = vpop.f32.mrf.mxu0 }
  0x89   :  { %v113_v2 = vadd.f32 %v314_v28, %v112_v22 }
  0x8b   :  { %v160_v4 = vmax.f32 %v113_v2, 0.0 }
  0x8c   :  { %v130_v20 = vpop.f32.mrf.mxu2  ;;  %v148_v21 = vpop.f32.mrf.mxu3 }
  0x8d   :  { %v149_v38 = vadd.f32 %v314_v28, %v148_v21  ;;  %v131_v54 = vadd.f32 %v314_v28, %v130_v20 }
  0x8f   :  { %v172_v41 = vmax.f32 %v149_v38, 0.0  ;;  %v166_v57 = vmax.f32 %v131_v54, 0.0 }
  0x90   :  { %v115_v27 = vpop.f32.mrf.mxu0 }
  0x91   :  { %v116_v0 = vadd.f32 %v314_v28, %v115_v27 }
  0x93   :  { %v161_v3 = vmax.f32 %v116_v0, 0.0 }
  0x94   :  { %v133_v23 = vpop.f32.mrf.mxu2  ;;  %v151_v24 = vpop.f32.mrf.mxu3 }
  0x95   :  { %v152_v35 = vadd.f32 %v314_v28, %v151_v24  ;;  %v134_v51 = vadd.f32 %v314_v28, %v133_v23 }
  0x97   :  { %v173_v39 = vmax.f32 %v152_v35, 0.0  ;;  %v167_v55 = vmax.f32 %v134_v51, 0.0 }
  0x98   :  { %v118_v34 = vpop.f32.mrf.mxu0 }
  0x99   :  { %v119_v62 = vadd.f32 %v314_v28, %v118_v34 }
  0x9b   :  { %v162_v1 = vmax.f32 %v119_v62, 0.0 }
  0x9c   :  { %v136_v25 = vpop.f32.mrf.mxu2  ;;  %v154_v26 = vpop.f32.mrf.mxu3 }
  0x9d   :  { %v155_v32 = vadd.f32 %v314_v28, %v154_v26  ;;  %v137_v49 = vadd.f32 %v314_v28, %v136_v25 }
  0x9f   :  { %v174_v36 = vmax.f32 %v155_v32, 0.0  ;;  %v168_v52 = vmax.f32 %v137_v49, 0.0 }
  0xa0   :  { %v121_v40 = vpop.f32.mrf.mxu0 }
  0xa1   :  { %v122_v60 = vadd.f32 %v314_v28, %v121_v40 }
  0xa3   :  { %v163_v63 = vmax.f32 %v122_v60, 0.0 }
  0xa4   :  { %v139_v29 = vpop.f32.mrf.mxu2  ;;  %v157_v30 = vpop.f32.mrf.mxu3 }
  0xa5   :  { %v158_v31 = vadd.f32 %v314_v28, %v157_v30  ;;  %v140_v46 = vadd.f32 %v314_v28, %v139_v29 }
  0xa7   :  { %v175_v33 = vmax.f32 %v158_v31, 0.0  ;;  %v169_v50 = vmax.f32 %v140_v46, 0.0 }
  0xa8   :  { %v124_v48 = vpop.f32.mrf.mxu0 }
  0xa9   :  { %288 = vmatpush.xpose.msk.msra.mxu1 %vm46_vm0, %v175_v33  ;;  %v125_v59 = vadd.f32 %v314_v28, %v124_v48 }
  0xab   :  { %v164_v61 = vmax.f32 %v125_v59, 0.0 }
  0xac   :  { %v142_v37 = vpop.f32.mrf.mxu2 }
  0xad   :  { %289 = vmatpush.xpose.msk.msra.mxu1 %vm46_vm0, %v174_v36  ;;  %v143_v44 = vadd.f32 %v314_v28, %v142_v37 }
  0xaf   :  { %v170_v47 = vmax.f32 %v143_v44, 0.0 }
  0xb0   :  { %v127_v53 = vpop.f32.mrf.mxu0 }
  0xb1   :  { %290 = vmatpush.xpose.msk.msra.mxu1 %vm46_vm0, %v173_v39  ;;  %v128_v56 = vadd.f32 %v314_v28, %v127_v53 }
  0xb3   :  { %v165_v58 = vmax.f32 %v128_v56, 0.0 }
  0xb4   :  { %v145_v42 = vpop.f32.mrf.mxu2 }
  0xb5   :  { %v146_v43 = vadd.f32 %v314_v28, %v145_v42  ;;  %291 = vmatpush.xpose.msk.msra.mxu1 %vm46_vm0, %v172_v41 }
  0xb7   :  { %v171_v45 = vmax.f32 %v146_v43, 0.0 }
  0xb9   :  { %292 = vmatpush.xpose.msk.msra.mxu1 %vm46_vm0, %v171_v45 }
  0xbd   :  { %293 = vmatpush.xpose.msk.msra.mxu1 %vm46_vm0, %v170_v47 }
  0xc1   :  { %294 = vmatpush.xpose.msk.msra.mxu1 %vm46_vm0, %v169_v50 }
  0xc5   :  { %295 = vmatpush.xpose.msk.msra.mxu1 %vm46_vm0, %v168_v52 }
  0xc9   :  { %296 = vmatpush.xpose.msk.msra.mxu1 %vm46_vm0, %v167_v55 }
  0xcd   :  { %297 = vmatpush.xpose.msk.msra.mxu1 %vm46_vm0, %v166_v57 }
  0xd1   :  { %298 = vmatpush.xpose.msk.msra.mxu1 %vm46_vm0, %v165_v58 }
  0xd5   :  { %299 = vmatpush.xpose.msk.msra.mxu1 %vm46_vm0, %v164_v61 }
  0xd9   :  { %300 = vmatpush.xpose.msk.msra.mxu1 %vm46_vm0, %v163_v63 }
  0xdd   :  { %301 = vmatpush.xpose.msk.msra.mxu1 %vm46_vm0, %v162_v1 }
  0xe1   :  { %302 = vmatpush.xpose.msk.msra.mxu1 %vm46_vm0, %v161_v3 }
  0xe5   :  { %303 = vmatpush.xpose.msk.msra.mxu1 %vm46_vm0, %v160_v4 }
  0xe8   :  { %304 = vmatmul.msk.f32.vlgmr.msra.gmra.mxu1 %vm46_vm0, %v176_v5 }
 0x165   :  { %v247_v7 = vpop.f32.mrf.mxu1 }
 0x166   :  { %v248_v8 = vadd.f32 %v247_v7, %v178_v6 }
 0x168   :  { %v250_v9 = vsub.f32 0.0, %v248_v8 }
 0x16a   :  { %v251_v10 = vmul.f32 1.442695, %v250_v9 }
 0x16c   :  { %315 = vpow2.f32 %v251_v10 }
 0x172   :  { %v316_v11 = vpop.eup %315 }
 0x173   :  { %v253_v12 = vadd.f32 1.0, %v316_v11 }
 0x175   :  { %317 = vrcp.f32 %v253_v12 }
 0x17b   :  { %v318_v13 = vpop.eup %317 }
 0x17c   :  { %255 = vst [vmem:[#allocation3] sm:$0x1] %v318_v13 }
 0x17d   :  { %266 = dma.vmem_to_hbm [thread:$0]  %s262_s11, 16, %s264_s3, [#allocation4]  }
 0x17e   :  { %343 = dma.done.wait [#allocation4], 16  }
 0x17f   :  { %344 = vsyncadd [#allocation4], 4294967280 }
 0x180   :  { %271 = vsyncpa [#allocation4], 1 }

</bundles_post_ra>
